<compile_context>
chip_gen: v5e
topology: v5e:2x2
jax: 0.10.0
libtpu: 0.0.40
codegen_flags: <defaults>
</compile_context>

<pallas_src>
import jax
import jax.numpy as jnp
from jax.experimental import pallas as pl
from jax.experimental.pallas import tpu as pltpu


def _make_cosent_kernel(temperature: float, batch_size: int, tile_rows: int):
    inv_temp = 1.0 / float(temperature)          # Python float -> literal, not a captured const
    inv_batch = 1.0 / float(batch_size)
    neg_inf = float("-inf")
    needs_mask = (batch_size % tile_rows) != 0   # static: only mask if last tile is partial

    def kernel(pos_ref, neg_ref, loss_ref, a_run, sn_run, b_run, sp_run):
        step = pl.program_id(0)

        @pl.when(step == 0)
        def _init():
            a_run[...] = jnp.full(a_run.shape, neg_inf, jnp.float32)
            b_run[...] = jnp.full(b_run.shape, neg_inf, jnp.float32)
            sn_run[...] = jnp.zeros(sn_run.shape, jnp.float32)
            sp_run[...] = jnp.zeros(sp_run.shape, jnp.float32)

        pos = pos_ref[...].astype(jnp.float32)
        neg = neg_ref[...].astype(jnp.float32)
        tb, m = pos.shape

        # Scores: sigmoid(logits) / T, 1/T folded into the same elementwise pass.
        # exp goes to the EUP slot; exp(-x) -> inf cleanly yields sigmoid 0.
        ns = (1.0 / (1.0 + jnp.exp(-neg))) * inv_temp        # neg scores
        mps = -(1.0 / (1.0 + jnp.exp(-pos))) * inv_temp      # minus pos scores

        if needs_mask:
            # Mask rows beyond the real batch (only the last, partial row tile).
            row = step * tile_rows + jax.lax.broadcasted_iota(jnp.int32, (tb, m), 0)
            valid = row < batch_size
            ns = jnp.where(valid, ns, neg_inf)
            mps = jnp.where(valid, mps, neg_inf)

        # Streaming (flash-style) per-column logsumexp over the batch axis
        # for the neg scores ...
        a_tile = jnp.max(ns, axis=0, keepdims=True)
        a_new = jnp.maximum(a_run[...], a_tile)
        sn_run[...] = sn_run[...] * jnp.exp(a_run[...] - a_new) + jnp.sum(
            jnp.exp(ns - a_new), axis=0, keepdims=True)
        a_run[...] = a_new

        # ... and for the negated pos scores.
        b_tile = jnp.max(mps, axis=0, keepdims=True)
        b_new = jnp.maximum(b_run[...], b_tile)
        sp_run[...] = sp_run[...] * jnp.exp(b_run[...] - b_new) + jnp.sum(
            jnp.exp(mps - b_new), axis=0, keepdims=True)
        b_run[...] = b_new

        @pl.when(step == pl.num_programs(0) - 1)
        def _finalize():
            # logsumexp over all pairwise differences plus the appended 0:
            #   sum_{i,k,m} exp(n[i,m] - p[k,m])
            #     = sum_m (sum_i exp n[i,m]) * (sum_k exp -p[k,m])
            c = a_run[...] + b_run[...]                                   # (1, m) per-column max diff
            m_g = jnp.maximum(jnp.max(c, axis=1, keepdims=True), 0.0)    # (1, 1), include appended 0
            total = jnp.sum(jnp.exp(c - m_g) * sn_run[...] * sp_run[...],
                            axis=1, keepdims=True)                       # (1, 1)
            lse = m_g + jnp.log(jnp.exp(-m_g) + total)                   # (1, 1)
            loss_ref[...] = lse * inv_batch

    return kernel


def cosent_loss_logits(pos_pair_logits, neg_pair_logits,
                       temperature: float = 0.05, margin: float = 0.0):
    """Forward of CoSentLoss_logits (PyTorch semantics), fused into one kernel."""
    del margin  # unused in the PyTorch forward; kept for API parity.
    pos = jnp.asarray(pos_pair_logits)
    neg = jnp.asarray(neg_pair_logits)
    assert pos.ndim == 2 and neg.ndim == 2, "expected (batch, num_pos)/(batch, num_neg)"
    assert pos.shape[0] == neg.shape[0], "pos/neg must share the batch dimension"
    b = pos.shape[0]

    # The PyTorch broadcast (neg[:,None,None] - pos[None,None,:]) pairs the last
    # dims elementwise (requires num_pos == num_neg or one of them == 1);
    # make that explicit so the kernel sees equal widths.
    m = max(pos.shape[1], neg.shape[1])
    if pos.shape[1] != m:
        pos = jnp.broadcast_to(pos, (b, m))
    if neg.shape[1] != m:
        neg = jnp.broadcast_to(neg, (b, m))

    tile_rows = b if b <= 512 else 512        # bounded VMEM, pipelined row tiles (512 % 8 == 0)
    grid = (pl.cdiv(b, tile_rows),)

    kernel = _make_cosent_kernel(float(temperature), b, tile_rows)
    out = pl.pallas_call(
        kernel,
        out_shape=jax.ShapeDtypeStruct((1, 1), jnp.float32),
        grid_spec=pltpu.PrefetchScalarGridSpec(
            num_scalar_prefetch=0,
            grid=grid,
            in_specs=[
                pl.BlockSpec((tile_rows, m), lambda i: (i, 0)),
                pl.BlockSpec((tile_rows, m), lambda i: (i, 0)),
            ],
            out_specs=pl.BlockSpec((1, 1), lambda i: (0, 0)),
            scratch_shapes=[
                pltpu.VMEM((1, m), jnp.float32),  # running max of neg scores
                pltpu.VMEM((1, m), jnp.float32),  # running sum exp(neg - max)
                pltpu.VMEM((1, m), jnp.float32),  # running max of -pos scores
                pltpu.VMEM((1, m), jnp.float32),  # running sum exp(-pos - max)
            ],
        ),
        compiler_params=pltpu.CompilerParams(
            dimension_semantics=("arbitrary",)),
    )(pos, neg)
    return out[0, 0]


def _reference(pos_pair_logits, neg_pair_logits, temperature=0.05):
    # Direct transcription of the PyTorch forward (materializes the full diff).
    ps = jax.nn.sigmoid(pos_pair_logits.astype(jnp.float32)) / temperature
    ns = jax.nn.sigmoid(neg_pair_logits.astype(jnp.float32)) / temperature
    diff = ns[:, None, None] - ps[None, None, :]
    dif = jnp.concatenate([diff.reshape(-1), jnp.zeros((1,), jnp.float32)])
    return jax.scipy.special.logsumexp(dif) / pos_pair_logits.shape[0]


if __name__ == "__main__":
    key = jax.random.PRNGKey(0)
    k1, k2 = jax.random.split(key)
    B, num_pos, num_neg = 8, 4, 4
    pos_pair_logits = jax.random.normal(k1, (B, num_pos), dtype=jnp.float32)
    neg_pair_logits = jax.random.normal(k2, (B, num_neg), dtype=jnp.float32)

    loss = cosent_loss_logits(pos_pair_logits, neg_pair_logits, temperature=0.05)
    loss = jax.block_until_ready(loss)

    ref = _reference(pos_pair_logits, neg_pair_logits, temperature=0.05)
    assert jnp.allclose(loss, ref, rtol=1e-5, atol=1e-5), (loss, ref)

    print("KERNEL_OK")
</pallas_src>

<mosaic_0001>
module attributes {stable_mosaic.version = 11 : i64} {
  func.func @kernel(%arg0: i32, %arg1: memref<8x4xf32, #tpu.memory_space<vmem>>, %arg2: memref<8x4xf32, #tpu.memory_space<vmem>>, %arg3: memref<1x1xf32, #tpu.memory_space<vmem>>, %arg4: memref<1x4xf32, #tpu.memory_space<vmem>>, %arg5: memref<1x4xf32, #tpu.memory_space<vmem>>, %arg6: memref<1x4xf32, #tpu.memory_space<vmem>>, %arg7: memref<1x4xf32, #tpu.memory_space<vmem>>) attributes {dimension_semantics = [#tpu.dimension_semantics<arbitrary>], iteration_bounds = array<i64: 1>, scalar_prefetch = 0 : i64, scratch_operands = 4 : i64, tpu.core_type = #tpu.core_type<tc>, window_params = [{transform_indices = @transform_0, window_bounds = array<i64: 8, 4>}, {transform_indices = @transform_1, window_bounds = array<i64: 8, 4>}, {pipeline_mode = #tpu.pipeline_mode<synchronous>, transform_indices = @transform_2, window_bounds = array<i64: 1, 1>}]} {
    %c0_i32 = arith.constant 0 : i32
    %0 = arith.cmpi eq, %arg0, %c0_i32 : i32
    %1 = arith.extui %0 : i1 to i32
    %c0_i32_0 = arith.constant 0 : i32
    %2 = arith.cmpi ne, %1, %c0_i32_0 : i32
    scf.if %2 {
      %cst_38 = arith.constant 0xFF800000 : f32
      %62 = vector.broadcast %cst_38 : f32 to vector<1x4xf32>
      %c0_39 = arith.constant 0 : index
      %c0_40 = arith.constant 0 : index
      %63 = vector.load %arg4[%c0_39, %c0_40] : memref<1x4xf32, #tpu.memory_space<vmem>>, vector<1x4xf32>
      tpu.vector_store %arg4[%c0_39, %c0_40], %62 {strides = array<i32>} : memref<1x4xf32, #tpu.memory_space<vmem>>, vector<1x4xf32>,
      %cst_41 = arith.constant 0xFF800000 : f32
      %64 = vector.broadcast %cst_41 : f32 to vector<1x4xf32>
      %c0_42 = arith.constant 0 : index
      %c0_43 = arith.constant 0 : index
      %65 = vector.load %arg6[%c0_42, %c0_43] : memref<1x4xf32, #tpu.memory_space<vmem>>, vector<1x4xf32>
      tpu.vector_store %arg6[%c0_42, %c0_43], %64 {strides = array<i32>} : memref<1x4xf32, #tpu.memory_space<vmem>>, vector<1x4xf32>,
      %cst_44 = arith.constant 0.000000e+00 : f32
      %66 = vector.broadcast %cst_44 : f32 to vector<1x4xf32>
      %c0_45 = arith.constant 0 : index
      %c0_46 = arith.constant 0 : index
      %67 = vector.load %arg5[%c0_45, %c0_46] : memref<1x4xf32, #tpu.memory_space<vmem>>, vector<1x4xf32>
      tpu.vector_store %arg5[%c0_45, %c0_46], %66 {strides = array<i32>} : memref<1x4xf32, #tpu.memory_space<vmem>>, vector<1x4xf32>,
      %cst_47 = arith.constant 0.000000e+00 : f32
      %68 = vector.broadcast %cst_47 : f32 to vector<1x4xf32>
      %c0_48 = arith.constant 0 : index
      %c0_49 = arith.constant 0 : index
      %69 = vector.load %arg7[%c0_48, %c0_49] : memref<1x4xf32, #tpu.memory_space<vmem>>, vector<1x4xf32>
      tpu.vector_store %arg7[%c0_48, %c0_49], %68 {strides = array<i32>} : memref<1x4xf32, #tpu.memory_space<vmem>>, vector<1x4xf32>,
    } else {
    }
    %c0 = arith.constant 0 : index
    %c0_1 = arith.constant 0 : index
    %3 = vector.load %arg1[%c0, %c0_1] : memref<8x4xf32, #tpu.memory_space<vmem>>, vector<8x4xf32>
    %c0_2 = arith.constant 0 : index
    %c0_3 = arith.constant 0 : index
    %4 = vector.load %arg2[%c0_2, %c0_3] : memref<8x4xf32, #tpu.memory_space<vmem>>, vector<8x4xf32>
    %cst = arith.constant 0.000000e+00 : f32
    %5 = vector.broadcast %cst : f32 to vector<8x4xf32>
    %6 = arith.subf %5, %4 : vector<8x4xf32>
    %7 = math.exp %6 : vector<8x4xf32>
    %cst_4 = arith.constant 1.000000e+00 : f32
    %8 = vector.broadcast %cst_4 : f32 to vector<8x4xf32>
    %9 = arith.addf %8, %7 : vector<8x4xf32>
    %cst_5 = arith.constant 1.000000e+00 : f32
    %10 = vector.broadcast %cst_5 : f32 to vector<8x4xf32>
    %11 = arith.divf %10, %9 : vector<8x4xf32>
    %cst_6 = arith.constant 2.000000e+01 : f32
    %12 = vector.broadcast %cst_6 : f32 to vector<8x4xf32>
    %13 = arith.mulf %11, %12 : vector<8x4xf32>
    %cst_7 = arith.constant 0.000000e+00 : f32
    %14 = vector.broadcast %cst_7 : f32 to vector<8x4xf32>
    %15 = arith.subf %14, %3 : vector<8x4xf32>
    %16 = math.exp %15 : vector<8x4xf32>
    %cst_8 = arith.constant 1.000000e+00 : f32
    %17 = vector.broadcast %cst_8 : f32 to vector<8x4xf32>
    %18 = arith.addf %17, %16 : vector<8x4xf32>
    %cst_9 = arith.constant 1.000000e+00 : f32
    %19 = vector.broadcast %cst_9 : f32 to vector<8x4xf32>
    %20 = arith.divf %19, %18 : vector<8x4xf32>
    %cst_10 = arith.constant 0.000000e+00 : f32
    %21 = vector.broadcast %cst_10 : f32 to vector<8x4xf32>
    %22 = arith.subf %21, %20 : vector<8x4xf32>
    %cst_11 = arith.constant 2.000000e+01 : f32
    %23 = vector.broadcast %cst_11 : f32 to vector<8x4xf32>
    %24 = arith.mulf %22, %23 : vector<8x4xf32>
    %cst_12 = arith.constant dense<0xFF800000> : vector<4xf32>
    %25 = vector.multi_reduction <maximumf>, %13, %cst_12 [0] : vector<8x4xf32> to vector<4xf32>
    %26 = vector.shape_cast %25 : vector<4xf32> to vector<1x4xf32>
    %c0_13 = arith.constant 0 : index
    %c0_14 = arith.constant 0 : index
    %27 = vector.load %arg4[%c0_13, %c0_14] : memref<1x4xf32, #tpu.memory_space<vmem>>, vector<1x4xf32>
    %28 = arith.maximumf %27, %26 : vector<1x4xf32>
    %c0_15 = arith.constant 0 : index
    %c0_16 = arith.constant 0 : index
    %29 = vector.load %arg5[%c0_15, %c0_16] : memref<1x4xf32, #tpu.memory_space<vmem>>, vector<1x4xf32>
    %c0_17 = arith.constant 0 : index
    %c0_18 = arith.constant 0 : index
    %30 = vector.load %arg4[%c0_17, %c0_18] : memref<1x4xf32, #tpu.memory_space<vmem>>, vector<1x4xf32>
    %31 = arith.subf %30, %28 : vector<1x4xf32>
    %32 = math.exp %31 : vector<1x4xf32>
    %33 = arith.mulf %29, %32 : vector<1x4xf32>
    %34 = vector.broadcast %28 : vector<1x4xf32> to vector<8x4xf32>
    %35 = arith.subf %13, %34 : vector<8x4xf32>
    %36 = math.exp %35 : vector<8x4xf32>
    %cst_19 = arith.constant dense<0.000000e+00> : vector<4xf32>
    %37 = vector.multi_reduction <add>, %36, %cst_19 [0] : vector<8x4xf32> to vector<4xf32>
    %38 = vector.shape_cast %37 : vector<4xf32> to vector<1x4xf32>
    %39 = arith.addf %33, %38 : vector<1x4xf32>
    %c0_20 = arith.constant 0 : index
    %c0_21 = arith.constant 0 : index
    %40 = vector.load %arg5[%c0_20, %c0_21] : memref<1x4xf32, #tpu.memory_space<vmem>>, vector<1x4xf32>
    tpu.vector_store %arg5[%c0_20, %c0_21], %39 {strides = array<i32>} : memref<1x4xf32, #tpu.memory_space<vmem>>, vector<1x4xf32>,
    %c0_22 = arith.constant 0 : index
    %c0_23 = arith.constant 0 : index
    %41 = vector.load %arg4[%c0_22, %c0_23] : memref<1x4xf32, #tpu.memory_space<vmem>>, vector<1x4xf32>
    tpu.vector_store %arg4[%c0_22, %c0_23], %28 {strides = array<i32>} : memref<1x4xf32, #tpu.memory_space<vmem>>, vector<1x4xf32>,
    %cst_24 = arith.constant dense<0xFF800000> : vector<4xf32>
    %42 = vector.multi_reduction <maximumf>, %24, %cst_24 [0] : vector<8x4xf32> to vector<4xf32>
    %43 = vector.shape_cast %42 : vector<4xf32> to vector<1x4xf32>
    %c0_25 = arith.constant 0 : index
    %c0_26 = arith.constant 0 : index
    %44 = vector.load %arg6[%c0_25, %c0_26] : memref<1x4xf32, #tpu.memory_space<vmem>>, vector<1x4xf32>
    %45 = arith.maximumf %44, %43 : vector<1x4xf32>
    %c0_27 = arith.constant 0 : index
    %c0_28 = arith.constant 0 : index
    %46 = vector.load %arg7[%c0_27, %c0_28] : memref<1x4xf32, #tpu.memory_space<vmem>>, vector<1x4xf32>
    %c0_29 = arith.constant 0 : index
    %c0_30 = arith.constant 0 : index
    %47 = vector.load %arg6[%c0_29, %c0_30] : memref<1x4xf32, #tpu.memory_space<vmem>>, vector<1x4xf32>
    %48 = arith.subf %47, %45 : vector<1x4xf32>
    %49 = math.exp %48 : vector<1x4xf32>
    %50 = arith.mulf %46, %49 : vector<1x4xf32>
    %51 = vector.broadcast %45 : vector<1x4xf32> to vector<8x4xf32>
    %52 = arith.subf %24, %51 : vector<8x4xf32>
    %53 = math.exp %52 : vector<8x4xf32>
    %cst_31 = arith.constant dense<0.000000e+00> : vector<4xf32>
    %54 = vector.multi_reduction <add>, %53, %cst_31 [0] : vector<8x4xf32> to vector<4xf32>
    %55 = vector.shape_cast %54 : vector<4xf32> to vector<1x4xf32>
    %56 = arith.addf %50, %55 : vector<1x4xf32>
    %c0_32 = arith.constant 0 : index
    %c0_33 = arith.constant 0 : index
    %57 = vector.load %arg7[%c0_32, %c0_33] : memref<1x4xf32, #tpu.memory_space<vmem>>, vector<1x4xf32>
    tpu.vector_store %arg7[%c0_32, %c0_33], %56 {strides = array<i32>} : memref<1x4xf32, #tpu.memory_space<vmem>>, vector<1x4xf32>,
    %c0_34 = arith.constant 0 : index
    %c0_35 = arith.constant 0 : index
    %58 = vector.load %arg6[%c0_34, %c0_35] : memref<1x4xf32, #tpu.memory_space<vmem>>, vector<1x4xf32>
    tpu.vector_store %arg6[%c0_34, %c0_35], %45 {strides = array<i32>} : memref<1x4xf32, #tpu.memory_space<vmem>>, vector<1x4xf32>,
    %c0_i32_36 = arith.constant 0 : i32
    %59 = arith.cmpi eq, %arg0, %c0_i32_36 : i32
    %60 = arith.extui %59 : i1 to i32
    %c0_i32_37 = arith.constant 0 : i32
    %61 = arith.cmpi ne, %60, %c0_i32_37 : i32
    scf.if %61 {
      %c0_38 = arith.constant 0 : index
      %c0_39 = arith.constant 0 : index
      %62 = vector.load %arg4[%c0_38, %c0_39] : memref<1x4xf32, #tpu.memory_space<vmem>>, vector<1x4xf32>
      %c0_40 = arith.constant 0 : index
      %c0_41 = arith.constant 0 : index
      %63 = vector.load %arg6[%c0_40, %c0_41] : memref<1x4xf32, #tpu.memory_space<vmem>>, vector<1x4xf32>
      %64 = arith.addf %62, %63 : vector<1x4xf32>
      %cst_42 = arith.constant dense<0xFF800000> : vector<1xf32>
      %65 = vector.multi_reduction <maximumf>, %64, %cst_42 [1] : vector<1x4xf32> to vector<1xf32>
      %66 = vector.shape_cast %65 : vector<1xf32> to vector<1x1xf32>
      %cst_43 = arith.constant 0.000000e+00 : f32
      %67 = vector.broadcast %cst_43 : f32 to vector<1x1xf32>
      %68 = arith.maximumf %66, %67 : vector<1x1xf32>
      %69 = vector.broadcast %68 : vector<1x1xf32> to vector<1x4xf32>
      %70 = arith.subf %64, %69 : vector<1x4xf32>
      %71 = math.exp %70 : vector<1x4xf32>
      %c0_44 = arith.constant 0 : index
      %c0_45 = arith.constant 0 : index
      %72 = vector.load %arg5[%c0_44, %c0_45] : memref<1x4xf32, #tpu.memory_space<vmem>>, vector<1x4xf32>
      %73 = arith.mulf %71, %72 : vector<1x4xf32>
      %c0_46 = arith.constant 0 : index
      %c0_47 = arith.constant 0 : index
      %74 = vector.load %arg7[%c0_46, %c0_47] : memref<1x4xf32, #tpu.memory_space<vmem>>, vector<1x4xf32>
      %75 = arith.mulf %73, %74 : vector<1x4xf32>
      %cst_48 = arith.constant dense<0.000000e+00> : vector<1xf32>
      %76 = vector.multi_reduction <add>, %75, %cst_48 [1] : vector<1x4xf32> to vector<1xf32>
      %77 = vector.shape_cast %76 : vector<1xf32> to vector<1x1xf32>
      %cst_49 = arith.constant 0.000000e+00 : f32
      %78 = vector.broadcast %cst_49 : f32 to vector<1x1xf32>
      %79 = arith.subf %78, %68 : vector<1x1xf32>
      %80 = math.exp %79 : vector<1x1xf32>
      %81 = arith.addf %80, %77 : vector<1x1xf32>
      %82 = math.log %81 : vector<1x1xf32>
      %83 = arith.addf %68, %82 : vector<1x1xf32>
      %cst_50 = arith.constant 1.250000e-01 : f32
      %84 = vector.broadcast %cst_50 : f32 to vector<1x1xf32>
      %85 = arith.mulf %83, %84 : vector<1x1xf32>
      %c0_51 = arith.constant 0 : index
      %c0_52 = arith.constant 0 : index
      %86 = vector.load %arg3[%c0_51, %c0_52] : memref<1x1xf32, #tpu.memory_space<vmem>>, vector<1x1xf32>
      tpu.vector_store %arg3[%c0_51, %c0_52], %85 {strides = array<i32>} : memref<1x1xf32, #tpu.memory_space<vmem>>, vector<1x1xf32>,
    } else {
    }
    return
  }
  func.func @transform_0(%arg0: i32) -> (i32, i32) {
    %c0_i32 = arith.constant 0 : i32
    %c0_i32_0 = arith.constant 0 : i32
    return %arg0, %c0_i32 : i32, i32
  }
  func.func @transform_1(%arg0: i32) -> (i32, i32) {
    %c0_i32 = arith.constant 0 : i32
    %c0_i32_0 = arith.constant 0 : i32
    return %arg0, %c0_i32 : i32, i32
  }
  func.func @transform_2(%arg0: i32) -> (i32, i32) {
    %c0_i32 = arith.constant 0 : i32
    %c0_i32_0 = arith.constant 0 : i32
    %c0_i32_1 = arith.constant 0 : i32
    return %c0_i32, %c0_i32_0 : i32, i32
  }
}

</mosaic_0001>

<bundles_post_ra>
// kernel: tpu_custom_call.1
= control target key start
LH: loop header
LB: loop body
LE: loop exit
PB: predicated region body
PF: predicated region fallthrough
CT: control target
= control target key end

     0   :  { %vm16_vm0 = vcmask 24576   ;;  %s264_s0 = inlined_call_operand.vmem [shape: f32[8,4], index: 0, kind: input, shape index: {}]   ;;  %s265_s1 = inlined_call_operand.vmem [shape: f32[8,4], index: 1, kind: input, shape index: {}]   ;;  %s266_s2 = inlined_call_operand.hbm [shape: f32[1,1], index: 2, kind: output, shape index: {}]  }
   0x1   :  { %v21_v0 = vld [vmem:[%s264_s0] sm:$0xff] }
   0x2   :  { %v22_v1 = vld [vmem:[%s265_s1] sm:$0xff] }
   0x3   :  { %7 = vsyncpa [#allocation7], 0  ;;  %v223_v2 = vmov -inf   ;;  %v23_v3 = vsub.f32 0.0, %v22_v1  ;;  %v43_v4 = vsub.f32 0.0, %v21_v0  ;;  %vm64_vm9 = vcmask 31744  }
   0x4   :  { %17 = vst.msk [vmem:[#allocation2] sm:$0x1] %vm16_vm0, %v223_v2  ;;  %s225_s0 = smov [#allocation6]   ;;  %s163_s15 = sshll.u32 %s266_s2, 4  ;;  %vm154_vm10 = vcmask 0   ;;  %s164_s15 = int_to_ptr.hbm [resolvable:$true] %s163_s15 }
   0x5   :  { %18 = vst.msk [vmem:[#allocation4] sm:$0x1] %vm16_vm0, %v223_v2  ;;  %v24_v5 = vmul.f32 1.442695, %v23_v3  ;;  %v44_v6 = vmul.f32 1.442695, %v43_v4 }
   0x6   :  { %s161_s1 = sshll.u32 %s225_s0, 4  ;;  %s162_s1 = int_to_ptr.vmem [resolvable:$true] %s161_s1 }
   0x7   :  { %175 = vpow2.f32 %v24_v5 }
   0x8   :  { %177 = vpow2.f32 %v44_v6 }
   0xb   :  { %v72_v44 = vld [vmem:[#allocation2] sm:$0x1] }
   0xc   :  { %v103_v49 = vld [vmem:[#allocation4] sm:$0x1] }
   0xd   :  { %v176_v7 = vpop.eup %175 }
   0xe   :  { %v178_v8 = vpop.eup %177  ;;  %v26_v9 = vadd.f32 1.0, %v176_v7  ;;  %v224_v7 = vmov 0.0  }
   0xf   :  { %v46_v10 = vadd.f32 1.0, %v178_v8  ;;  %19 = vst.msk [vmem:[#allocation3] sm:$0x1] %vm16_vm0, %v224_v7 }
  0x10   :  { %179 = vrcp.f32 %v26_v9  ;;  %vm32_vm1 = vweird.f32 %v26_v9  ;;  %v38_v14 = vand.u32 2147483648, %v26_v9  ;;  %v36_v17 = vand.u32 2147483647, %v26_v9  ;;  %20 = vst.msk [vmem:[#allocation5] sm:$0x1] %vm16_vm0, %v224_v7 }
  0x11   :  { %181 = vrcp.f32 %v46_v10  ;;  %v58_v18 = vand.u32 2147483648, %v46_v10  ;;  %vm52_vm3 = vweird.f32 %v46_v10  ;;  %v56_v20 = vand.u32 2147483647, %v46_v10 }
  0x12   :  { %v39_v22 = vor.u32 1.1754944e-38, %v38_v14  ;;  %vm37_vm6 = vcmp.eq.f32.partialorder %v36_v17, 8.507059e+37 }
  0x13   :  { %v59_v25 = vor.u32 1.1754944e-38, %v58_v18  ;;  %vm57_vm8 = vcmp.eq.f32.partialorder %v56_v20, 8.507059e+37 }
  0x16   :  { %v180_v11 = vpop.eup %179  ;;  %v74_v18 = vld [vmem:[#allocation3] sm:$0x1] }
  0x17   :  { %v182_v12 = vpop.eup %181  ;;  %v28_v13 = vmul.f32 %v180_v11, %v26_v9  ;;  %vm33_vm2 = vweird.f32 %v180_v11 }
  0x18   :  { %v48_v15 = vmul.f32 %v182_v12, %v46_v10  ;;  %vm53_vm4 = vweird.f32 %v182_v12  ;;  %vm34_vm5 = vmor %vm32_vm1, %vm33_vm2 }
  0x19   :  { %v29_v16 = vsub.f32 1.0, %v28_v13  ;;  %vm54_vm7 = vmor %vm52_vm3, %vm53_vm4 }
  0x1a   :  { %v49_v19 = vsub.f32 1.0, %v48_v15 }
  0x1b   :  { %v30_v21 = vmul.f32 %v180_v11, %v29_v16 }
  0x1c   :  { %v50_v23 = vmul.f32 %v182_v12, %v49_v19 }
  0x1d   :  { %v31_v24 = vadd.f32 %v180_v11, %v30_v21 }
  0x1e   :  { %v51_v26 = vadd.f32 %v182_v12, %v50_v23 }
  0x1f   :  { %v35_v27 = vsel %vm34_vm5, %v180_v11, %v31_v24 }
  0x20   :  { %v40_v28 = vsel %vm37_vm6, %v39_v22, %v35_v27  ;;  %v55_v29 = vsel %vm54_vm7, %v182_v12, %v51_v26  ;;  %v105_v22 = vld [vmem:[#allocation5] sm:$0x1] }
  0x21   :  { %v42_v30 = vmul.f32 20.0, %v40_v28  ;;  %v60_v31 = vsel %vm57_vm8, %v59_v25, %v55_v29 }
  0x22   :  { %v62_v32 = vsub.f32 0.0, %v60_v31 }
  0x23   :  { %v65_v33 = vsel %vm64_vm9, %v42_v30, -inf }
  0x24   :  { %v63_v34 = vmul.f32 20.0, %v62_v32  ;;  %v66_v35 = vrot.slane %v65_v33, 4 }
  0x26   :  { %v67_v36 = vmax.f32 %v65_v33, %v66_v35  ;;  %v96_v37 = vsel %vm64_vm9, %v63_v34, -inf }
  0x27   :  { %v97_v38 = vrot.slane %v96_v37, 4 }
  0x28   :  { %v68_v39 = vrot.slane %v67_v36, 2 }
  0x29   :  { %v98_v40 = vmax.f32 %v96_v37, %v97_v38 }
  0x2a   :  { %v69_v41 = vmax.f32 %v67_v36, %v68_v39 }
  0x2b   :  { %v99_v42 = vrot.slane %v98_v40, 2 }
  0x2c   :  { %v70_v43 = vrot.slane %v69_v41, 1 }
  0x2d   :  { %v100_v45 = vmax.f32 %v98_v40, %v99_v42 }
  0x2e   :  { %v71_v46 = vmax.f32 %v69_v41, %v70_v43 }
  0x2f   :  { %v101_v47 = vrot.slane %v100_v45, 1 }
  0x30   :  { %v73_v48 = vmax.f32 %v72_v44, %v71_v46 }
  0x31   :  { %v102_v50 = vmax.f32 %v100_v45, %v101_v47 }
  0x32   :  { %95 = vst.msk [vmem:[#allocation2] sm:$0x1] %vm16_vm0, %v73_v48  ;;  %v75_v51 = vsub.f32 %v72_v44, %v73_v48  ;;  %v80_v52 = vperm.slane %v73_v48, 0 }
  0x33   :  { %v104_v53 = vmax.f32 %v103_v49, %v102_v50 }
  0x34   :  { %v82_v54 = vsub.f32 %v42_v30, %v80_v52  ;;  %v76_v1 = vmul.f32 1.442695, %v75_v51 }
  0x35   :  { %v106_v55 = vsub.f32 %v103_v49, %v104_v53  ;;  %v111_v56 = vperm.slane %v104_v53, 0  ;;  %125 = vst.msk [vmem:[#allocation4] sm:$0x1] %vm16_vm0, %v104_v53 }
  0x36   :  { %v83_v62 = vmul.f32 1.442695, %v82_v54 }
  0x37   :  { %v113_v57 = vsub.f32 %v63_v34, %v111_v56  ;;  %v107_v3 = vmul.f32 1.442695, %v106_v55 }
  0x38   :  { %183 = vpow2.f32 %v83_v62 }
  0x39   :  { %v129_v58 = vld [vmem:[#allocation2] sm:$0x1]  ;;  %v114_v63 = vmul.f32 1.442695, %v113_v57 }
  0x3b   :  { %185 = vpow2.f32 %v114_v63 }
  0x3c   :  { %v130_v59 = vld [vmem:[#allocation4] sm:$0x1]  ;;  %187 = vpow2.f32 %v76_v1 }
  0x3d   :  { %v131_v60 = vadd.f32 %v130_v59, %v129_v58  ;;  %189 = vpow2.f32 %v107_v3 }
  0x3e   :  { %v184_v0 = vpop.eup %183 }
  0x3f   :  { %v132_v61 = vsel %vm16_vm0, %v131_v60, -inf  ;;  %v85_v4 = vsel %vm64_vm9, %v184_v0, 0.0 }
  0x40   :  { %133 = vmax.xlane.f32.xlu0 %v132_v61  ;;  %v86_v5 = vrot.slane %v85_v4, 4 }
  0x41   :  { %v186_v2 = vpop.eup %185 }
  0x42   :  { %v116_v6 = vsel %vm64_vm9, %v186_v2, 0.0  ;;  %v87_v8 = vadd.f32 %v86_v5, %v85_v4  ;;  %v188_v14 = vpop.eup %187 }
  0x43   :  { %v117_v9 = vrot.slane %v116_v6, 4  ;;  %v190_v17 = vpop.eup %189  ;;  %v78_v19 = vmul.f32 %v188_v14, %v74_v18 }
  0x44   :  { %v88_v10 = vrot.slane %v87_v8, 2  ;;  %v109_v24 = vmul.f32 %v190_v17, %v105_v22 }
  0x45   :  { %v118_v11 = vadd.f32 %v117_v9, %v116_v6 }
  0x46   :  { %v89_v12 = vadd.f32 %v88_v10, %v87_v8 }
  0x47   :  { %v119_v13 = vrot.slane %v118_v11, 2 }
  0x48   :  { %v90_v15 = vrot.slane %v89_v12, 1 }
  0x49   :  { %v120_v16 = vadd.f32 %v119_v13, %v118_v11 }
  0x4a   :  { %v91_v20 = vadd.f32 %v90_v15, %v89_v12 }
  0x4b   :  { %v121_v21 = vrot.slane %v120_v16, 1 }
  0x4c   :  { %v92_v23 = vadd.f32 %v91_v20, %v78_v19 }
  0x4d   :  { %v122_v25 = vadd.f32 %v121_v21, %v120_v16 }
  0x4e   :  { %94 = vst.msk [vmem:[#allocation3] sm:$0x1] %vm16_vm0, %v92_v23 }
  0x4f   :  { %v123_v26 = vadd.f32 %v122_v25, %v109_v24 }
  0x51   :  { %124 = vst.msk [vmem:[#allocation5] sm:$0x1] %vm16_vm0, %v123_v26 }
  0x55   :  { %v139_v31 = vld [vmem:[#allocation3] sm:$0x1] }
  0x58   :  { %v141_v33 = vld [vmem:[#allocation5] sm:$0x1] }
  0xb3   :  { %v134_v27 = vpop.xlane.xlu0 %133 }
  0xb4   :  { %v135_v28 = vmax.f32 %v134_v27, 0.0 }
  0xb6   :  { %v136_v29 = vsub.f32 %v131_v60, %v135_v28  ;;  %v146_v37 = vsub.f32 0.0, %v135_v28 }
  0xb8   :  { %v137_v30 = vmul.f32 1.442695, %v136_v29  ;;  %v147_v38 = vmul.f32 1.442695, %v146_v37 }
  0xba   :  { %191 = vpow2.f32 %v137_v30 }
  0xbb   :  { %193 = vpow2.f32 %v147_v38 }
  0xc0   :  { %v192_v32 = vpop.eup %191 }
  0xc1   :  { %v140_v34 = vmul.f32 %v192_v32, %v139_v31  ;;  %v194_v39 = vpop.eup %193 }
  0xc3   :  { %v142_v35 = vmul.f32 %v141_v33, %v140_v34 }
  0xc5   :  { %v143_v36 = vsel %vm16_vm0, %v142_v35, 0.0 }
  0xc6   :  { %144 = vadd.xlane.f32.xlu0 %v143_v36 }
 0x139   :  { %v145_v40 = vpop.xlane.xlu0 %144 }
 0x13a   :  { %v149_v41 = vadd.f32 %v194_v39, %v145_v40 }
 0x13c   :  { %195 = vlog2.f32 %v149_v41 }
 0x142   :  { %v196_v42 = vpop.eup %195 }
 0x143   :  { %v151_v43 = vmul.f32 0.6931472, %v196_v42 }
 0x145   :  { %v152_v44 = vadd.f32 %v151_v43, %v135_v28 }
 0x147   :  { %v153_v45 = vmul.f32 0.125, %v152_v44 }
 0x149   :  { %155 = vst.msk [vmem:[#allocation6] sm:$0x1] %vm154_vm10, %v153_v45 }
 0x14a   :  { %166 = dma.vmem_to_hbm [thread:$0]  %s162_s1, 16, %s164_s15, [#allocation7]  }
 0x14b   :  { %221 = dma.done.wait [#allocation7], 16  }
 0x14c   :  { %222 = vsyncadd [#allocation7], 4294967280 }
 0x14d   :  { %171 = vsyncpa [#allocation7], 1 }

</bundles_post_ra>
